<compile_context>
chip_gen: v7x
topology: tpu7x:2x2x1
jax: 0.10.0
libtpu: 0.0.40
codegen_flags: <defaults>
</compile_context>

<pallas_src>
import jax
import jax.numpy as jnp
from jax.experimental import pallas as pl
from jax.experimental.pallas import tpu as pltpu

IN_DIM = 4
HID_DIM = 64
OUT_DIM = 3
MAX_TILE_B = 4096          # rows per grid step (sublane axis of the native layout)
VMEM_LIMIT_BYTES = 48 * 1024 * 1024   # > v5e 16MiB default, < v7x 64MiB physical


def _round_up(n, m):
    return ((n + m - 1) // m) * m


def _choose_tile(batch):
    """Pick the batch tile: big enough to amortize per-step overhead, small
    enough for VMEM (lane-padded narrow blocks), and >= 2 grid steps when the
    batch allows it so v7x's two TensorCores both get work."""
    if batch <= 1024:
        return _round_up(max(batch, 8), 8)           # single tile; overhead irrelevant
    return min(MAX_TILE_B, _round_up(pl.cdiv(batch, 2), 512))


def net_kernel(x_ref, w1_ref, b1_ref, w2_ref, b2_ref, o_ref):
    """One batch tile in native layout (batch on the sublane axis).

    x:  [TILE_B, IN]   f32
    w1: [IN, HID]      bf16   (Linear(4, 64).weight transposed; VMEM-resident)
    b1: [1, HID]       f32
    w2: [HID, OUT]     bf16   (Linear(64, 3).weight transposed; VMEM-resident)
    b2: [1, OUT]       f32
    o:  [TILE_B, OUT]  f32    (log-probs)
    """
    # Linear(4, 64): single bf16 MXU pass, f32 accumulation.
    x = x_ref[...].astype(jnp.bfloat16)
    h = jnp.dot(x, w1_ref[...], preferred_element_type=jnp.float32)
    h = h + b1_ref[...]

    # ReQU: relu(h) ** 2   (f32, VPU)
    h = jnp.maximum(h, 0.0)
    h = h * h

    # Linear(64, 3): single bf16 MXU pass, f32 accumulation.
    logits = jnp.dot(h.astype(jnp.bfloat16), w2_ref[...],
                     preferred_element_type=jnp.float32)
    logits = logits + b2_ref[...]

    # Numerically stable log-softmax over the 3-class minor axis.
    m = jnp.max(logits, axis=-1, keepdims=True)
    z = logits - m
    lse = jnp.log(jnp.sum(jnp.exp(z), axis=-1, keepdims=True))
    o_ref[...] = z - lse


def net_forward(x, w1, b1, w2, b2):
    """Forward pass of Net. x: [B, 4] f32; params in PyTorch layout. Returns [B, 3] f32."""
    B = x.shape[0]
    tile_b = _choose_tile(B)
    grid = pl.cdiv(B, tile_b)           # ragged tail handled by Pallas edge masking

    x = x.astype(jnp.float32)
    w1t = w1.T.astype(jnp.bfloat16)                      # [IN, HID]   (tiny, resident)
    b1r = b1.reshape(1, HID_DIM).astype(jnp.float32)     # [1, HID]
    w2t = w2.T.astype(jnp.bfloat16)                      # [HID, OUT]
    b2r = b2.reshape(1, OUT_DIM).astype(jnp.float32)     # [1, OUT]

    cost = pl.CostEstimate(
        flops=2 * B * (IN_DIM * HID_DIM + HID_DIM * OUT_DIM),
        transcendentals=4 * B,  # 3x exp + 1x log per row
        bytes_accessed=(B * (IN_DIM + OUT_DIM) * 4
                        + IN_DIM * HID_DIM * 2 + HID_DIM * 4
                        + HID_DIM * OUT_DIM * 2 + OUT_DIM * 4),
    )

    return pl.pallas_call(
        net_kernel,
        out_shape=jax.ShapeDtypeStruct((B, OUT_DIM), jnp.float32),
        grid=(grid,),
        in_specs=[
            pl.BlockSpec((tile_b, IN_DIM), lambda i: (i, 0)),    # x tile (pipelined)
            pl.BlockSpec((IN_DIM, HID_DIM), lambda i: (0, 0)),   # W1^T (VMEM-resident)
            pl.BlockSpec((1, HID_DIM), lambda i: (0, 0)),        # b1
            pl.BlockSpec((HID_DIM, OUT_DIM), lambda i: (0, 0)),  # W2^T (VMEM-resident)
            pl.BlockSpec((1, OUT_DIM), lambda i: (0, 0)),        # b2
        ],
        out_specs=pl.BlockSpec((tile_b, OUT_DIM), lambda i: (i, 0)),
        compiler_params=pltpu.CompilerParams(
            dimension_semantics=("parallel",),       # batch is embarrassingly parallel
            vmem_limit_bytes=VMEM_LIMIT_BYTES,
        ),
        cost_estimate=cost,
    )(x, w1t, b1r, w2t, b2r)


def init_params(key):
    # Deterministic synthetic init (uniform, PyTorch-Linear-like fan_in scaling),
    # stored in PyTorch layout: W1 [HID, IN], b1 [HID], W2 [OUT, HID], b2 [OUT].
    k1, k2, k3, k4 = jax.random.split(key, 4)
    bound1 = 1.0 / (IN_DIM ** 0.5)
    bound2 = 1.0 / (HID_DIM ** 0.5)
    w1 = jax.random.uniform(k1, (HID_DIM, IN_DIM), jnp.float32, -bound1, bound1)
    b1 = jax.random.uniform(k2, (HID_DIM,), jnp.float32, -bound1, bound1)
    w2 = jax.random.uniform(k3, (OUT_DIM, HID_DIM), jnp.float32, -bound2, bound2)
    b2 = jax.random.uniform(k4, (OUT_DIM,), jnp.float32, -bound2, bound2)
    return w1, b1, w2, b2


def reference_forward(x, w1, b1, w2, b2):
    h = x @ w1.T + b1
    h = jnp.maximum(h, 0.0) ** 2
    logits = h @ w2.T + b2
    return jax.nn.log_softmax(logits, axis=-1)


def _check(B, key):
    k_params, k_x = jax.random.split(key)
    x = jax.random.normal(k_x, (B, IN_DIM), jnp.float32)
    w1, b1, w2, b2 = init_params(k_params)

    out = jax.block_until_ready(net_forward(x, w1, b1, w2, b2))

    # Reference mirrors the kernel's bf16 quantization of x / W1 / W2; the
    # in-kernel bf16 cast of h (second MXU operand) is the only remaining
    # difference, hence the tolerance.
    xq = x.astype(jnp.bfloat16).astype(jnp.float32)
    w1q = w1.astype(jnp.bfloat16).astype(jnp.float32)
    w2q = w2.astype(jnp.bfloat16).astype(jnp.float32)
    ref = reference_forward(xq, w1q, b1, w2q, b2)

    assert out.shape == (B, OUT_DIM)
    assert bool(jnp.all(jnp.isfinite(out)))
    assert jnp.allclose(out, ref, atol=2e-2, rtol=2e-2), \
        float(jnp.max(jnp.abs(out - ref)))


if __name__ == "__main__":
    key = jax.random.PRNGKey(0)
    _check(8, key)      # small batch, single tile
    _check(2500, key)   # multi-tile ragged batch (grid=2, masked tail rows)
    print("KERNEL_OK")
</pallas_src>

<mosaic_0001>
module attributes {stable_mosaic.version = 11 : i64} {
  func.func @net_kernel(%arg0: i32, %arg1: memref<8x4xf32, #tpu.memory_space<vmem>>, %arg2: memref<4x64xbf16, #tpu.memory_space<vmem>>, %arg3: memref<1x64xf32, #tpu.memory_space<vmem>>, %arg4: memref<64x3xbf16, #tpu.memory_space<vmem>>, %arg5: memref<1x3xf32, #tpu.memory_space<vmem>>, %arg6: memref<8x3xf32, #tpu.memory_space<vmem>>) attributes {dimension_semantics = [#tpu.dimension_semantics<parallel>], iteration_bounds = array<i64: 1>, scalar_prefetch = 0 : i64, scratch_operands = 0 : i64, tpu.core_type = #tpu.core_type<tc>, window_params = [{transform_indices = @transform_0, window_bounds = array<i64: 8, 4>}, {pipeline_mode = #tpu.pipeline_mode<synchronous>, transform_indices = @transform_1, window_bounds = array<i64: 4, 64>}, {pipeline_mode = #tpu.pipeline_mode<synchronous>, transform_indices = @transform_2, window_bounds = array<i64: 1, 64>}, {pipeline_mode = #tpu.pipeline_mode<synchronous>, transform_indices = @transform_3, window_bounds = array<i64: 64, 3>}, {pipeline_mode = #tpu.pipeline_mode<synchronous>, transform_indices = @transform_4, window_bounds = array<i64: 1, 3>}, {transform_indices = @transform_5, window_bounds = array<i64: 8, 3>}]} {
    %c0 = arith.constant 0 : index
    %c0_0 = arith.constant 0 : index
    %0 = vector.load %arg1[%c0, %c0_0] : memref<8x4xf32, #tpu.memory_space<vmem>>, vector<8x4xf32>
    %1 = arith.truncf %0 : vector<8x4xf32> to vector<8x4xbf16>
    %c0_1 = arith.constant 0 : index
    %c0_2 = arith.constant 0 : index
    %2 = vector.load %arg2[%c0_1, %c0_2] : memref<4x64xbf16, #tpu.memory_space<vmem>>, vector<4x64xbf16>
    %cst = arith.constant dense<0.000000e+00> : vector<8x64xf32>
    %3 = tpu.matmul %1, %2, %cst {dimension_numbers = #tpu.dot_dimension_numbers<[1], [0], [0], [1], [0, 0, 1, 1], [], []>} : vector<8x4xbf16>, vector<4x64xbf16>, vector<8x64xf32> -> vector<8x64xf32>
    %c0_3 = arith.constant 0 : index
    %c0_4 = arith.constant 0 : index
    %4 = vector.load %arg3[%c0_3, %c0_4] : memref<1x64xf32, #tpu.memory_space<vmem>>, vector<1x64xf32>
    %5 = vector.broadcast %4 : vector<1x64xf32> to vector<8x64xf32>
    %6 = arith.addf %3, %5 : vector<8x64xf32>
    %cst_5 = arith.constant 0.000000e+00 : f32
    %7 = vector.broadcast %cst_5 : f32 to vector<8x64xf32>
    %8 = arith.maximumf %6, %7 : vector<8x64xf32>
    %9 = arith.mulf %8, %8 : vector<8x64xf32>
    %10 = arith.truncf %9 : vector<8x64xf32> to vector<8x64xbf16>
    %c0_6 = arith.constant 0 : index
    %c0_7 = arith.constant 0 : index
    %11 = vector.load %arg4[%c0_6, %c0_7] : memref<64x3xbf16, #tpu.memory_space<vmem>>, vector<64x3xbf16>
    %cst_8 = arith.constant dense<0.000000e+00> : vector<8x3xf32>
    %12 = tpu.matmul %10, %11, %cst_8 {dimension_numbers = #tpu.dot_dimension_numbers<[1], [0], [0], [1], [0, 0, 1, 1], [], []>} : vector<8x64xbf16>, vector<64x3xbf16>, vector<8x3xf32> -> vector<8x3xf32>
    %c0_9 = arith.constant 0 : index
    %c0_10 = arith.constant 0 : index
    %13 = vector.load %arg5[%c0_9, %c0_10] : memref<1x3xf32, #tpu.memory_space<vmem>>, vector<1x3xf32>
    %14 = vector.broadcast %13 : vector<1x3xf32> to vector<8x3xf32>
    %15 = arith.addf %12, %14 : vector<8x3xf32>
    %cst_11 = arith.constant dense<0xFF800000> : vector<8xf32>
    %16 = vector.multi_reduction <maximumf>, %15, %cst_11 [1] : vector<8x3xf32> to vector<8xf32>
    %17 = vector.shape_cast %16 : vector<8xf32> to vector<8x1xf32>
    %18 = vector.broadcast %17 : vector<8x1xf32> to vector<8x3xf32>
    %19 = arith.subf %15, %18 : vector<8x3xf32>
    %20 = math.exp %19 : vector<8x3xf32>
    %cst_12 = arith.constant dense<0.000000e+00> : vector<8xf32>
    %21 = vector.multi_reduction <add>, %20, %cst_12 [1] : vector<8x3xf32> to vector<8xf32>
    %22 = vector.shape_cast %21 : vector<8xf32> to vector<8x1xf32>
    %23 = math.log %22 : vector<8x1xf32>
    %24 = vector.broadcast %23 : vector<8x1xf32> to vector<8x3xf32>
    %25 = arith.subf %19, %24 : vector<8x3xf32>
    %c0_13 = arith.constant 0 : index
    %c0_14 = arith.constant 0 : index
    %26 = vector.load %arg6[%c0_13, %c0_14] : memref<8x3xf32, #tpu.memory_space<vmem>>, vector<8x3xf32>
    tpu.vector_store %arg6[%c0_13, %c0_14], %25 {strides = array<i32>} : memref<8x3xf32, #tpu.memory_space<vmem>>, vector<8x3xf32>,
    return
  }
  func.func @transform_0(%arg0: i32) -> (i32, i32) {
    %c0_i32 = arith.constant 0 : i32
    %c0_i32_0 = arith.constant 0 : i32
    return %arg0, %c0_i32 : i32, i32
  }
  func.func @transform_1(%arg0: i32) -> (i32, i32) {
    %c0_i32 = arith.constant 0 : i32
    %c0_i32_0 = arith.constant 0 : i32
    %c0_i32_1 = arith.constant 0 : i32
    return %c0_i32, %c0_i32_0 : i32, i32
  }
  func.func @transform_2(%arg0: i32) -> (i32, i32) {
    %c0_i32 = arith.constant 0 : i32
    %c0_i32_0 = arith.constant 0 : i32
    %c0_i32_1 = arith.constant 0 : i32
    return %c0_i32, %c0_i32_0 : i32, i32
  }
  func.func @transform_3(%arg0: i32) -> (i32, i32) {
    %c0_i32 = arith.constant 0 : i32
    %c0_i32_0 = arith.constant 0 : i32
    %c0_i32_1 = arith.constant 0 : i32
    return %c0_i32, %c0_i32_0 : i32, i32
  }
  func.func @transform_4(%arg0: i32) -> (i32, i32) {
    %c0_i32 = arith.constant 0 : i32
    %c0_i32_0 = arith.constant 0 : i32
    %c0_i32_1 = arith.constant 0 : i32
    return %c0_i32, %c0_i32_0 : i32, i32
  }
  func.func @transform_5(%arg0: i32) -> (i32, i32) {
    %c0_i32 = arith.constant 0 : i32
    %c0_i32_0 = arith.constant 0 : i32
    return %arg0, %c0_i32 : i32, i32
  }
}

</mosaic_0001>

<bundles_post_ra>
// kernel: tpu_custom_call.1
= control target key start
LH: loop header
LB: loop body
LE: loop exit
PB: predicated region body
PF: predicated region fallthrough
CT: control target
= control target key end

     0   :  { %vm35_vm0 = vcmask 1041408   ;;  %v226_v0 = vmov 0.0   ;;  %vm227_vm1 = vmmov 0   ;;  %vm31_vm2 = vcmask 31744   ;;  %s288_s1 = inlined_call_operand.vmem [shape: bf16[4,64], index: 1, kind: input, shape index: {}]   ;;  %s289_s0 = inlined_call_operand.vmem [shape: f32[8,4], index: 0, kind: input, shape index: {}]   ;;  %s290_s3 = inlined_call_operand.vmem [shape: bf16[64,3], index: 3, kind: input, shape index: {}]   ;;  %s291_s2 = inlined_call_operand.vmem [shape: f32[1,64], index: 2, kind: input, shape index: {}]   ;;  %s292_s4 = inlined_call_operand.vmem [shape: f32[1,3], index: 4, kind: input, shape index: {}]   ;;  %s293_s5 = inlined_call_operand.vmem [shape: f32[8,3], index: 5, kind: output, shape index: {}]  }
   0x1   :  { %198 = vmatprep.subr.bf16.mxu0 %v226_v0  ;;  %v23_v1 = vld [vmem:[%s288_s1] sm:$0x3]  ;;  %200 = vmatprep.mubr.msk.bf16.mxu0 %vm227_vm1, %v226_v0  ;;  %v219_v6 = vld [vmem:[%s290_s3 + $0x8] sm:$0xff]   ;;  %v220_v7 = vld [vmem:[%s290_s3 + $0x10] sm:$0xff]   ;;  %vm121_vm3 = vcmask 523264   ;;  %vm165_vm4 = vcmask 23552  }
   0x2   :  { %v21_v2 = vld [vmem:[%s289_s0] sm:$0xff]  ;;  %v37_v3 = vsel %vm35_vm0, %v23_v1, 0  ;;  %204 = vmatprep.subr.bf16.mxu1 %v226_v0  ;;  %212 = vmatprep.mubr.msk.bf16.mxu1 %vm227_vm1, %v226_v0  ;;  %v221_v8 = vld [vmem:[%s290_s3 + $0x18] sm:$0xff]  }
   0x3   :  { %v22_v4 = vpack.c.bf16 %v21_v2, %v21_v2  ;;  %v218_v5 = vld [vmem:[%s290_s3] sm:$0xff]   ;;  %199 = vmatpush3.bf16.msra.mxu0 %v37_v3 }
   0x4   :  { %205 = vmatpush3.bf16.msra.mxu1 %v218_v5  ;;  %v183_v9 = vld [vmem:[%s291_s2] ss:$0 sm:$0xff] }
   0x5   :  { %206 = vmatprep.subr.bf16.mxu1 %v226_v0  ;;  %v185_v18 = vld [vmem:[%s292_s4] ss:$0 sm:$0xff] }
   0x6   :  { %201 = vmatmul.mubr.msk.bf16.vlgmr.msra.gmra.mrb[0].mxu0 %vm31_vm2, %v22_v4 }
   0x8   :  { %207 = vmatpush3.bf16.msra.mxu1 %v219_v6 }
   0x9   :  { %208 = vmatprep.subr.bf16.mxu1 %v226_v0 }
   0xc   :  { %209 = vmatpush3.bf16.msra.mxu1 %v220_v7 }
   0xd   :  { %210 = vmatprep.subr.bf16.mxu1 %v226_v0 }
  0x10   :  { %211 = vmatpush3.bf16.msra.mxu1 %v221_v8 }
  0xd9   :  { %v73_v10 = vpop.f32.mrb[0].mxu0 }
  0xda   :  { %v74_v11 = vadd.f32 %v183_v9, %v73_v10  ;;  %v202_v12 = vpop.f32.mrb[1].mxu0 }
  0xdb   :  { %v76_v13 = vpop.f32.mrb[2].mxu0 }
  0xdc   :  { %v79_v14 = vmax.f32 %v74_v11, 0.0  ;;  %v203_v15 = vpop.f32.mrb[3].mxu0 }
  0xde   :  { %v80_v16 = vmul.f32 %v79_v14, %v79_v14 }
  0xe0   :  { %v81_v17 = vpack.c.bf16 %v80_v16, %v80_v16 }
  0xe2   :  { %213 = vmatmul.mubr.msk.bf16.vlgmr.msra.gmra.mrb[0].mxu1 %vm121_vm3, %v81_v17 }
 0x1b5   :  { %v159_v19 = vpop.f32.mrb[0].mxu1 }
 0x1b6   :  { %v160_v20 = vadd.f32 %v185_v18, %v159_v19  ;;  %v214_v21 = vpop.f32.mrb[1].mxu1 }
 0x1b7   :  { %v162_v22 = vpop.f32.mrb[2].mxu1 }
 0x1b8   :  { %v215_v23 = vpop.f32.mrb[3].mxu1  ;;  %v166_v24 = vsel %vm165_vm4, %v160_v20, -inf }
 0x1b9   :  { %167 = vmax.xlane.f32.xlu0 %v166_v24 }
 0x246   :  { %v168_v25 = vpop.xlane.xlu0 %167 }
 0x247   :  { %v169_v26 = vsub.f32 %v160_v20, %v168_v25 }
 0x249   :  { %v170_v27 = vmul.f32 1.442695, %v169_v26 }
 0x24b   :  { %222 = vpow2.f32 %v170_v27 }
 0x255   :  { %v223_v28 = vpop.eup %222 }
 0x256   :  { %v172_v29 = vsel %vm165_vm4, %v223_v28, 0.0 }
 0x257   :  { %173 = vadd.xlane.f32.xlu0 %v172_v29 }
 0x2e4   :  { %v174_v30 = vpop.xlane.xlu0 %173 }
 0x2e5   :  { %224 = vlog2.f32 %v174_v30 }
 0x2ef   :  { %v225_v31 = vpop.eup %224 }
 0x2f0   :  { %v176_v32 = vmul.f32 0.6931472, %v225_v31 }
 0x2f2   :  { %v177_v33 = vsub.f32 %v169_v26, %v176_v32 }
 0x2f4   :  { %178 = vst.msk [vmem:[%s293_s5] sm:$0xff] %vm165_vm4, %v177_v33 }

</bundles_post_ra>
